<compile_context>
chip_gen: v7x
topology: tpu7x:2x2x1
jax: 0.10.0
libtpu: 0.0.40
codegen_flags: <defaults>
</compile_context>

<pallas_src>
import jax
import jax.numpy as jnp
from jax import lax
from jax.experimental import pallas as pl
from jax.experimental.pallas import tpu as pltpu


def _conv_quant_kernel(p_ref, w_ref, s_ref, b_ref, o_ref):
    """One (batch, HW-tile) output block.

    p_ref: (1, 9*IC, T) bf16  transposed im2col patches, row index = tap*IC + ic
    w_ref: (OC, 9*IC)   bf16  transposed 3x3 conv weights
    s_ref: (OC, 1)      f32   scale * 2^-shift_n
    b_ref: (OC, 1)      f32   (bias*scale + 2^(shift_n-1)) * 2^-shift_n
    o_ref: (1, OC, T)   bf16  quantized + ReLU output (lane-dense, T % 128 == 0)
    """
    # Single fused MXU contraction; result (OC, T) is already lane-dense,
    # no in-kernel relayout needed.
    acc = jnp.dot(w_ref[...], p_ref[0],
                  preferred_element_type=jnp.float32)          # (OC, T)
    # Folded requant: floor(acc*s_eff + b_eff) == ((acc+bias)*scale + rnd) >> n
    # exactly while |(acc + bias) * scale| < 2^24 (true for int8-range data at
    # these channel counts).
    q = jnp.floor(acc * s_ref[...] + b_ref[...])
    # clamp(-128,127) followed by ReLU == clip to [0, 127].
    o_ref[...] = jnp.clip(q, 0.0, 127.0).astype(o_ref.dtype)[None]


def _pick_hw_tile(hw, cap=2048):
    """Largest multiple-of-128 divisor of hw that is <= cap (or hw if small)."""
    if hw <= cap:
        return hw
    best = 0
    t = 128
    while t <= cap:
        if hw % t == 0:
            best = t
        t += 128
    if best == 0:
        # TODO(synk): pad HW up to a multiple of 128 for awkward spatial sizes.
        return hw
    return best


def tb_module_3x3_forward(x_nchw, int_weight, int_bias, int_scale,
                          shift_n=8, hw_tile_cap=2048):
    """x_nchw: (N, IC, H, W) integer-valued array (int8-range magnitudes).
       int_weight: (9, IC, OC) with tap k = dy*3 + dx; int_bias/int_scale: (OC,).
       Returns (N, H, W, OC) integer-valued float32 output (dense NHWC)."""
    x = jnp.transpose(x_nchw, (0, 2, 3, 1)).astype(jnp.bfloat16)   # NHWC; exact for |x| <= 256
    N, H, W, IC = x.shape
    OC = int_weight.shape[2]
    K9 = 9 * IC
    HW = H * W

    # --- wrapper-side (plain XLA) prep -------------------------------------
    # Transposed im2col: patches_T[n, k*IC+ic, y*W+x] = x_pad[n, y+dy, x+dx, ic]
    x_pad = jnp.pad(x, ((0, 0), (1, 1), (1, 1), (0, 0)))
    taps = [jnp.transpose(x_pad[:, dy:dy + H, dx:dx + W, :],
                          (0, 3, 1, 2)).reshape(N, IC, HW)
            for dy in range(3) for dx in range(3)]
    patches_T = jnp.concatenate(taps, axis=1)                      # (N, 9IC, HW)

    # Transposed weight: w_T[oc, k*IC+ic] = int_weight[k, ic, oc]
    w_T = jnp.transpose(int_weight.astype(jnp.bfloat16), (2, 0, 1)).reshape(OC, K9)

    # Fold the requant affine (exact: power-of-two factors, small ints).
    scale_f = int_scale.astype(jnp.float32)
    bias_f = int_bias.astype(jnp.float32)
    inv = jnp.float32(2.0 ** (-shift_n))
    s_eff = (scale_f * inv).reshape(OC, 1)
    b_eff = ((bias_f * scale_f + jnp.float32(2.0 ** (shift_n - 1))) * inv).reshape(OC, 1)

    t_hw = _pick_hw_tile(HW, hw_tile_cap)
    grid = (N, HW // t_hw)

    out_t = pl.pallas_call(
        _conv_quant_kernel,
        out_shape=jax.ShapeDtypeStruct((N, OC, HW), jnp.bfloat16),
        grid=grid,
        in_specs=[
            pl.BlockSpec((1, K9, t_hw), lambda n, t: (n, 0, t)),
            pl.BlockSpec((OC, K9), lambda n, t: (0, 0)),
            pl.BlockSpec((OC, 1), lambda n, t: (0, 0)),
            pl.BlockSpec((OC, 1), lambda n, t: (0, 0)),
        ],
        out_specs=pl.BlockSpec((1, OC, t_hw), lambda n, t: (n, 0, t)),
        compiler_params=pltpu.CompilerParams(
            dimension_semantics=("parallel", "parallel")),
    )(patches_T, w_T, s_eff, b_eff)

    # Layout plumbing back to NHWC (outside the kernel; values are exact ints).
    out = jnp.transpose(out_t.reshape(N, OC, H, W), (0, 2, 3, 1))
    return out.astype(jnp.float32)


def _reference(x_nchw, int_weight, int_bias, int_scale, shift_n=8):
    """Pure-JAX reference (dense equivalent of the Minkowski forward)."""
    x = jnp.transpose(x_nchw.astype(jnp.float32), (0, 2, 3, 1))
    IC, OC = int_weight.shape[1], int_weight.shape[2]
    w_hwio = int_weight.astype(jnp.float32).reshape(3, 3, IC, OC)
    psum = lax.conv_general_dilated(
        x, w_hwio, window_strides=(1, 1), padding="SAME",
        dimension_numbers=("NHWC", "HWIO", "NHWC"))
    mul = (psum + int_bias.astype(jnp.float32)) * int_scale.astype(jnp.float32)
    mul = mul + float(2 ** (shift_n - 1))
    shifted = mul.astype(jnp.int32) >> shift_n          # exact: mul is integer-valued
    clamped = jnp.clip(shifted.astype(jnp.float32), -128.0, 127.0)
    return jnp.maximum(clamped, 0.0)


if __name__ == "__main__":
    N, IC, H, W, OC = 2, 4, 16, 16, 8
    shift_n = 8

    key = jax.random.PRNGKey(0)
    kx, kw, kb, ks = jax.random.split(key, 4)
    # int8-style inputs / weights, modest magnitudes so arithmetic is exact.
    x = jax.random.randint(kx, (N, IC, H, W), -4, 5, dtype=jnp.int32)
    int_weight = jax.random.randint(kw, (9, IC, OC), -4, 5, dtype=jnp.int32)
    int_bias = jax.random.randint(kb, (OC,), -16, 17, dtype=jnp.int32)
    int_scale = jax.random.randint(ks, (OC,), 1, 9, dtype=jnp.int32)

    out = tb_module_3x3_forward(x, int_weight, int_bias, int_scale, shift_n)
    out = jax.block_until_ready(out)

    ref = _reference(x, int_weight, int_bias, int_scale, shift_n)
    assert out.shape == (N, H, W, OC), out.shape
    assert jnp.max(jnp.abs(out - ref)) == 0.0, "mismatch vs reference"

    print("KERNEL_OK")
</pallas_src>

<mosaic_0001>
module attributes {stable_mosaic.version = 11 : i64} {
  func.func @_conv_quant_kernel(%arg0: i32, %arg1: i32, %arg2: memref<1x36x256xbf16, #tpu.memory_space<vmem>>, %arg3: memref<8x36xbf16, #tpu.memory_space<vmem>>, %arg4: memref<8x1xf32, #tpu.memory_space<vmem>>, %arg5: memref<8x1xf32, #tpu.memory_space<vmem>>, %arg6: memref<1x8x256xbf16, #tpu.memory_space<vmem>>) attributes {dimension_semantics = [#tpu.dimension_semantics<parallel>, #tpu.dimension_semantics<parallel>], iteration_bounds = array<i64: 2, 1>, scalar_prefetch = 0 : i64, scratch_operands = 0 : i64, tpu.core_type = #tpu.core_type<tc>, window_params = [{transform_indices = @transform_0, window_bounds = array<i64: 1, 36, 256>}, {pipeline_mode = #tpu.pipeline_mode<synchronous>, transform_indices = @transform_1, window_bounds = array<i64: 8, 36>}, {pipeline_mode = #tpu.pipeline_mode<synchronous>, transform_indices = @transform_2, window_bounds = array<i64: 8, 1>}, {pipeline_mode = #tpu.pipeline_mode<synchronous>, transform_indices = @transform_3, window_bounds = array<i64: 8, 1>}, {transform_indices = @transform_4, window_bounds = array<i64: 1, 8, 256>}]} {
    %c0 = arith.constant 0 : index
    %c0_0 = arith.constant 0 : index
    %0 = vector.load %arg3[%c0, %c0_0] : memref<8x36xbf16, #tpu.memory_space<vmem>>, vector<8x36xbf16>
    %c0_1 = arith.constant 0 : index
    %c0_2 = arith.constant 0 : index
    %c0_3 = arith.constant 0 : index
    %1 = vector.load %arg2[%c0_1, %c0_2, %c0_3] : memref<1x36x256xbf16, #tpu.memory_space<vmem>>, vector<1x36x256xbf16>
    %2 = vector.shape_cast %1 : vector<1x36x256xbf16> to vector<36x256xbf16>
    %cst = arith.constant dense<0.000000e+00> : vector<8x256xf32>
    %3 = tpu.matmul %0, %2, %cst {dimension_numbers = #tpu.dot_dimension_numbers<[1], [0], [0], [1], [0, 0, 1, 1], [], []>} : vector<8x36xbf16>, vector<36x256xbf16>, vector<8x256xf32> -> vector<8x256xf32>
    %c0_4 = arith.constant 0 : index
    %c0_5 = arith.constant 0 : index
    %4 = vector.load %arg4[%c0_4, %c0_5] : memref<8x1xf32, #tpu.memory_space<vmem>>, vector<8x1xf32>
    %5 = vector.broadcast %4 : vector<8x1xf32> to vector<8x256xf32>
    %6 = arith.mulf %3, %5 : vector<8x256xf32>
    %c0_6 = arith.constant 0 : index
    %c0_7 = arith.constant 0 : index
    %7 = vector.load %arg5[%c0_6, %c0_7] : memref<8x1xf32, #tpu.memory_space<vmem>>, vector<8x1xf32>
    %8 = vector.broadcast %7 : vector<8x1xf32> to vector<8x256xf32>
    %9 = arith.addf %6, %8 : vector<8x256xf32>
    %10 = math.floor %9 : vector<8x256xf32>
    %cst_8 = arith.constant 0.000000e+00 : f32
    %cst_9 = arith.constant 1.270000e+02 : f32
    %11 = vector.broadcast %cst_8 : f32 to vector<8x256xf32>
    %12 = arith.maximumf %11, %10 : vector<8x256xf32>
    %13 = vector.broadcast %cst_9 : f32 to vector<8x256xf32>
    %14 = arith.minimumf %13, %12 : vector<8x256xf32>
    %15 = arith.truncf %14 : vector<8x256xf32> to vector<8x256xbf16>
    %16 = vector.shape_cast %15 : vector<8x256xbf16> to vector<1x8x256xbf16>
    %c0_10 = arith.constant 0 : index
    %c0_11 = arith.constant 0 : index
    %c0_12 = arith.constant 0 : index
    %17 = vector.load %arg6[%c0_10, %c0_11, %c0_12] : memref<1x8x256xbf16, #tpu.memory_space<vmem>>, vector<1x8x256xbf16>
    tpu.vector_store %arg6[%c0_10, %c0_11, %c0_12], %16 {strides = array<i32>} : memref<1x8x256xbf16, #tpu.memory_space<vmem>>, vector<1x8x256xbf16>,
    return
  }
  func.func @transform_0(%arg0: i32, %arg1: i32) -> (i32, i32, i32) {
    %c0_i32 = arith.constant 0 : i32
    %c0_i32_0 = arith.constant 0 : i32
    return %arg0, %c0_i32, %arg1 : i32, i32, i32
  }
  func.func @transform_1(%arg0: i32, %arg1: i32) -> (i32, i32) {
    %c0_i32 = arith.constant 0 : i32
    %c0_i32_0 = arith.constant 0 : i32
    %c0_i32_1 = arith.constant 0 : i32
    return %c0_i32, %c0_i32_0 : i32, i32
  }
  func.func @transform_2(%arg0: i32, %arg1: i32) -> (i32, i32) {
    %c0_i32 = arith.constant 0 : i32
    %c0_i32_0 = arith.constant 0 : i32
    %c0_i32_1 = arith.constant 0 : i32
    return %c0_i32, %c0_i32_0 : i32, i32
  }
  func.func @transform_3(%arg0: i32, %arg1: i32) -> (i32, i32) {
    %c0_i32 = arith.constant 0 : i32
    %c0_i32_0 = arith.constant 0 : i32
    %c0_i32_1 = arith.constant 0 : i32
    return %c0_i32, %c0_i32_0 : i32, i32
  }
  func.func @transform_4(%arg0: i32, %arg1: i32) -> (i32, i32, i32) {
    %c0_i32 = arith.constant 0 : i32
    %c0_i32_0 = arith.constant 0 : i32
    return %arg0, %c0_i32, %arg1 : i32, i32, i32
  }
}

</mosaic_0001>

<bundles_post_ra>
// kernel: tpu_custom_call.1
= control target key start
LH: loop header
LB: loop body
LE: loop exit
PB: predicated region body
PF: predicated region fallthrough
CT: control target
= control target key end

     0   :  { %9 = vsyncpa [#allocation3], 0  ;;  %s752_s0 = inlined_call_operand.vmem [shape: bf16[2,36,256], index: 0, kind: input, shape index: {}]   ;;  %s753_s1 = inlined_call_operand.vmem [shape: bf16[8,36], index: 1, kind: input, shape index: {}]   ;;  %s754_s2 = inlined_call_operand.vmem [shape: f32[8,1], index: 2, kind: input, shape index: {}]   ;;  %s755_s3 = inlined_call_operand.vmem [shape: f32[8,1], index: 3, kind: input, shape index: {}]   ;;  %s756_s4 = inlined_call_operand.hbm [shape: bf16[2,8,256], index: 4, kind: output, shape index: {}]  }
   0x1   :  { %11 = vsyncpa [#allocation3 + $0x1], 0  ;;  %s631_s15 = smov 0   ;;  %s633_s16 = smov 0  }
   0x2   :  { %s635_s17 = smov 0   ;;  %s637_s18 = smov 0  }
   0x3   :  { %s639_s19 = smov 0   ;;  %s641_s20 = smov 0  }
   0x4 LB: > { %s435_s21 = sadd.s32 4294967295, %s602_s20   ;;  %s436_s22 = sadd.s32 4294967294, %s602_s20   ;;  %s602_s20 = sphi %s641_s20, %s17_s20   ;;  %s598_s19 = sphi %s639_s19, %s763_s19   ;;  %s594_s18 = sphi %s637_s18, %s762_s18   ;;  %s590_s17 = sphi %s635_s17, %s761_s17   ;;  %s586_s16 = sphi %s633_s16, %s760_s16   ;;  %s582_s15 = sphi %s631_s15, %s759_s15  }
   0x5   : > { %s29_s23 = sadd.s32 1, %s598_s19  ;;  %s129_s24 = sadd.s32 1, %s590_s17 }
   0x6   : > { %p31_p0 = scmp.ge.s32.totalorder %s29_s23, 2  ;;  %p139_p1 = scmp.ne.s32.totalorder %s590_s17, %s586_s16 }
   0x7   : > { %p140_p2 = scmp.eq.s32.totalorder %s435_s21, 1  ;;  %p145_p3 = scmp.ne.s32.totalorder %s586_s16, %s582_s15 }
   0x8   : > { %s765_s23 = smov (%p31_p0, %s29_s23), 0  ;;  %p146_p5 = scmp.eq.s32.totalorder %s436_s22, 1 }
   0x9   : > { %p671_p4 = por %p140_p2, %p139_p1  ;;  %s124_s26 = ssub.s32 %s598_s19, %s765_s23 }
   0xa   : > { %p439_p6 = scmp.ge.s32.totalorder %s602_s20, 1  ;;  %p127_p7 = scmp.eq.s32.totalorder %s124_s26, 0 }
   0xb   : > { %p678_p8 = por %p146_p5, %p145_p3  ;;  %p186_p9 = scmp.lt.s32.totalorder %s602_s20, 3 }
   0xc   : > { %s684_s28 = scalar_select %p127_p7, %s590_s17, %s129_s24  }
   0xd   : > { %p187_p10 = pnand %p439_p6, %p186_p9 }
   0xe   : > { %p217_p11 = scmp.lt.s32.totalorder (!%p187_p10), %s594_s18, 1  ;;  %v604_v0 = vmov (!%p187_p10), 0   ;;  %v311_v1 = vld [vmem:[%s754_s2] sm:$0xff] (!%p187_p10)  ;;  %vm263_vm0 = vcmask (!%p187_p10), 1041408   ;;  %vm259_vm1 = vcmask (!%p187_p10), 293888   ;;  %s213_s14 = sand.u32 (!%p187_p10), 1, %s586_s16  }
   0xf   : > { %190 = sbr.rel (%p187_p10) target bundleno = 279 (0x117), region = 36  ;;  %302 = vmatprep.mubr.bf16.mxu0 (!%p187_p10), %v604_v0  ;;  %515 = vset.pattern.permute.xlu0 (!%p187_p10), %v604_v0  ;;  %v319_v2 = vld [vmem:[%s755_s3] sm:$0xff] (!%p187_p10)  ;;  %s440_s21 = sshll.u32 (!%p187_p10), %s213_s14, 3 }
  0x10   : > { %314 = vperm.xlu0 (!%p187_p10), %515, %v311_v1   ;;  %v228_v11 = vld [vmem:[%s753_s1] sm:$0xf] (!%p187_p10)  ;;  %s457_s22 = sshll.u32 (!%p187_p10), %s594_s18, 7  ;;  %s215_s24 = scalar_lea.vmem (!%p187_p10), [#allocation2], %s440_s21 }
  0x11   : > { %s359_s26 = sshll.u32 (!%p187_p10), %s215_s24, 4  ;;  %s343_s6 = scalar_lea.sflag (!%p187_p10), [#allocation3], %s213_s14  ;;  %s707_s26 = int_to_ptr.vmem [resolvable:$true] %s359_s26 }
  0x12   : > { %s524_s7 = scalar_lea.vmem (!%p187_p10), %s707_s26, 128 }
  0x13   : > { %p525_p12 = scmp.ne.s32.totalorder (!%p187_p10), %s707_s26, %s524_s7 }
  0x14   : > { %322 = vperm.xlu0 (!%p187_p10), %515, %v319_v2  }
  0x15   : > { %p526_p13 = pnand (!%p187_p10), %p525_p12, %p671_p4 }
  0x16   : > { %s218_s5 = scalar_select %p217_p11, %s594_s18, 1 }
  0x17   : > { %p527_p0 = pneg %p526_p13  ;;  %s605_s18 = smov [#allocation2]  }
  0x18   : > { %s458_s8 = smul.u32 40, %s218_s5  ;;  %s705_s5 = scalar_lea.hbm %s756_s4, %s457_s22 }
  0x1a   : > { %s224_s11 = scalar_lea.vmem %s752_s0, %s458_s8  ;;  %s528_s8 = sshll.u32 %s605_s18, 4  ;;  %s529_s8 = int_to_ptr.vmem [resolvable:$false] %s528_s8 }
  0x1b   : > { %v516_v3 = vld [vmem:[%s224_s11 + $0x4] ss:$8 sps:$4 sm:$0xff]   ;;  %v518_v4 = vld [vmem:[%s224_s11] ss:$8 sps:$4 sm:$0xff]   ;;  %v519_v5 = vld [vmem:[%s224_s11 + $0x14] ss:$8 sps:$4 sm:$0xff]   ;;  %p531_p1 = scmp.lt.s32.totalorder %s707_s26, %s529_s8 }
  0x1c   : > { %270 = vmatprep.subr.bf16.mxu0 %v516_v3  ;;  %v233_v6 = vld [vmem:[%s224_s11 + $0x20] sm:$0x33]  ;;  %v521_v7 = vld [vmem:[%s224_s11 + $0x10] ss:$8 sps:$4 sm:$0xff]   ;;  %s530_s9 = scalar_lea.vmem %s529_s8, 256 }
  0x1d   : > { %271 = vmatpush1.bf16.msra.mxu0 %v518_v4  ;;  %v447_v8 = vcombine.high %v233_v6, %v233_v6  ;;  %v446_v9 = vcombine.low %v233_v6, %v233_v6  ;;  %p532_p2 = scmp.lt.s32.totalorder %s530_s9, %s524_s7 }
  0x1e   : > { %272 = vmatprep.subr.bf16.mxu0 %v519_v5 }
  0x1f   : > { %v265_v10 = vsel %vm263_vm0, %v446_v9, 0  ;;  %p533_p3 = por %p532_p2, %p531_p1 }
  0x21   : > { %273 = vmatpush1.bf16.msra.mxu0 %v521_v7  ;;  %p534_p5 = pnand %p533_p3, %p527_p0 }
  0x22   : > { %448 = vmatprep.subr.msk.bf16.mxu0 %vm263_vm0, %v447_v8 }
  0x25   : > { %275 = vmatpush1.bf16.msra.mxu0 %v265_v10 }
  0x28   : > { %449 = vmatmul.mubr.msk.bf16.vlgmr.msra.gmra.mrb[0].mxu0 %vm259_vm1, %v228_v11 }
  0x8f   : > { %v315_v12 = vpop.permute.xlu0 %314 }
  0x93   : > { %v323_v16 = vpop.permute.xlu0 %322 }
  0xfb   : > { %v304_v13 = vpop.f32.mrb[0].mxu0 }
  0xfc   : > { %v317_v14 = vmul.f32 %v315_v12, %v304_v13  ;;  %v306_v15 = vpop.f32.mrb[1].mxu0 }
  0xfd   : > { %v318_v17 = vmul.f32 %v315_v12, %v306_v15  ;;  %v308_v18 = vpop.f32.mrb[2].mxu0 }
  0xfe   : > { %v325_v19 = vadd.f32 %v323_v16, %v317_v14  ;;  %v309_v20 = vpop.f32.mrb[3].mxu0 }
  0xff   : > { %v326_v21 = vadd.f32 %v323_v16, %v318_v17 }
 0x100   : > { %v327_v22 = vfloor.f32 %v325_v19 }
 0x101   : > { %v328_v23 = vfloor.f32 %v326_v21 }
 0x102   : > { %v329_v24 = vmax.f32 %v327_v22, 0.0 }
 0x103   : > { %v330_v25 = vmax.f32 %v328_v23, 0.0 }
 0x104   : > { %v331_v26 = vmin.f32 %v329_v24, 127.0 }
 0x105   : > { %v332_v27 = vmin.f32 %v330_v25, 127.0 }
 0x107   : > { %v456_v28 = vpack.c.bf16 %v332_v27, %v331_v26 }
 0x109   : > { %341 = vst [vmem:[%s215_s24] sm:$0xff] %v456_v28 }
 0x10a   : > { %537 = shalt.err (!%p534_p5)
}
 0x10b   : > { %s538_s10 = scalar_lea.hbm %s705_s5, 128  ;;  %s542_s13 = scalar_lea.hbm %s756_s4, 256 }
 0x10c   : > { %p539_p6 = scmp.ne.s32.totalorder %s705_s5, %s538_s10  ;;  %p543_p10 = scmp.lt.u32.totalorder %s705_s5, %s756_s4 }
 0x10d   : > { %p544_p11 = scmp.lt.u32.totalorder %s542_s13, %s538_s10  ;;  %p546_p13 = scmp.lt.u32.totalorder %s538_s10, %s705_s5 }
 0x10e   : > { %p540_p7 = pnand %p539_p6, %p671_p4 }
 0x10f   : > { %p545_p12 = por %p544_p11, %p543_p10 }
 0x110   : > { %p541_p9 = pneg %p540_p7 }
 0x111   : > { %p547_p0 = por %p546_p13, %p545_p12 }
 0x113   : > { %p548_p1 = pnand %p547_p0, %p541_p9 }
 0x115   : > { %551 = shalt.err (!%p548_p1)
}
 0x116   : > { %459 = dma.vmem_to_hbm [thread:$0]  (%p671_p4), %s707_s26, 128, %s705_s5, %s343_s6  }
 0x117 PF: > { %p465_p2 = scmp.ge.s32.totalorder %s602_s20, 2  ;;  %s371_s22 = sand.u32 1, %s582_s15  }
 0x118   : > { %s372_s24 = scalar_lea.sflag [#allocation3], %s371_s22 }
 0x119   : > { %p462_p3 = pnand %p465_p2, %p678_p8 }
 0x11b   : > { %577 = dma.done.wait (!%p462_p3), %s372_s24, 128  }
 0x11c   : > { %579 = vsyncadd (!%p462_p3), %s372_s24, 4294967168  ;;  %s17_s20 = sadd.s32 1, %s602_s20   ;;  %s759_s15 = smov %s586_s16 }
 0x11d   : > { %p14_p5 = scmp.ge.s32.totalorder %s17_s20, 4   ;;  %s760_s16 = smov %s590_s17 }
 0x11e   : > { %s761_s17 = smov %s684_s28  ;;  %s762_s18 = smov %s598_s19 }
 0x11f   : > { %s763_s19 = smov %s765_s23  ;;  %16 = sbr.rel (!%p14_p5) target bundleno = 4 (0x4), region = 71 }
 0x126   :  { %377 = vsyncpa [#allocation3], 1 }
 0x127   :  { %379 = vsyncpa [#allocation3 + $0x1], 1 }

</bundles_post_ra>
